<compile_context>
chip_gen: v6e
topology: v6e:2x2x1
jax: 0.10.0
libtpu: 0.0.40
codegen_flags: <defaults>
</compile_context>

<pallas_src>
import math
import jax
import jax.numpy as jnp
from jax.experimental import pallas as pl
from jax.experimental.pallas import tpu as pltpu

EPS = 1e-5  # nn.LayerNorm default


def _make_kernel(kv_tile):
    def kernel(x_ref, q_ref, k_ref, v_ref,
               wo_ref, w1_ref, w2_ref, vec_ref, b1_ref,
               o_ref):
        f32, bf16 = jnp.float32, jnp.bfloat16

        x = x_ref[...].astype(f32)          # (TQ, D)  query tile (f32 residual)
        q = q_ref[...]                      # (H, TQ, dh) bf16, scale+bias folded
        TQ, D = x.shape
        nH, _, dh = q.shape
        S = k_ref.shape[1]
        num_kv = S // kv_tile               # static

        vecs = vec_ref[...]                 # (6, D) packed f32 vectors
        bo, b2 = vecs[0:1], vecs[1:2]
        g1, be1, g2, be2 = vecs[2:3], vecs[3:4], vecs[4:5], vecs[5:6]

        # --- multi-head attention, heads = leading batch dim ----------------
        if num_kv == 1:
            # direct softmax (whole sequence in one KV tile)
            k = k_ref[...]                  # (H, S, dh) bf16
            v = v_ref[...]
            s = jnp.einsum("hqd,hkd->hqk", q, k,
                           preferred_element_type=f32)          # (H, TQ, S)
            m = jnp.max(s, axis=-1, keepdims=True)
            p = jnp.exp(s - m)
            l = jnp.sum(p, axis=-1, keepdims=True)
            acc = jnp.einsum("hqk,hkd->hqd", p.astype(bf16), v,
                             preferred_element_type=f32)        # (H, TQ, dh)
        else:
            # online (flash) softmax over KV tiles: score VMEM is (H, TQ, TK)
            def body(i, carry):
                m, l, acc = carry
                start = pl.multiple_of(i * kv_tile, kv_tile)
                kt = k_ref[:, pl.ds(start, kv_tile), :]          # (H, TK, dh)
                vt = v_ref[:, pl.ds(start, kv_tile), :]
                s = jnp.einsum("hqd,hkd->hqk", q, kt,
                               preferred_element_type=f32)       # (H, TQ, TK)
                m_new = jnp.maximum(m, jnp.max(s, axis=-1, keepdims=True))
                alpha = jnp.exp(m - m_new)
                p = jnp.exp(s - m_new)
                l = alpha * l + jnp.sum(p, axis=-1, keepdims=True)
                acc = alpha * acc + jnp.einsum(
                    "hqk,hkd->hqd", p.astype(bf16), vt,
                    preferred_element_type=f32)
                return m_new, l, acc

            m0 = jnp.full((nH, TQ, 1), -1e30, f32)
            l0 = jnp.zeros((nH, TQ, 1), f32)
            a0 = jnp.zeros((nH, TQ, dh), f32)
            _, l, acc = jax.lax.fori_loop(0, num_kv, body, (m0, l0, a0))

        a3 = acc * pl.reciprocal(l, approx=True)                 # EUP, not VALU
        attn = a3.transpose(1, 0, 2).reshape(TQ, D)              # head merge

        proj = jnp.dot(attn.astype(bf16), wo_ref[...],
                       preferred_element_type=f32) + bo          # (TQ, D)

        # --- residual + LayerNorm 1 (f32 stats) ------------------------------
        h1 = x + proj                                            # dropout1 == id
        mu = jnp.mean(h1, axis=-1, keepdims=True)
        var = jnp.mean((h1 - mu) ** 2, axis=-1, keepdims=True)
        h1n = (h1 - mu) * jax.lax.rsqrt(var + EPS) * g1 + be1

        # --- position-wise FFN ------------------------------------------------
        f = jnp.dot(h1n.astype(bf16), w1_ref[...],
                    preferred_element_type=f32) + b1_ref[...]
        f = jnp.maximum(f, 0.0)                                  # ReLU
        f = jnp.dot(f.astype(bf16), w2_ref[...],
                    preferred_element_type=f32) + b2

        # --- residual + LayerNorm 2 -------------------------------------------
        h2 = h1n + f                                             # dropout2 == id
        mu2 = jnp.mean(h2, axis=-1, keepdims=True)
        var2 = jnp.mean((h2 - mu2) ** 2, axis=-1, keepdims=True)
        h2n = (h2 - mu2) * jax.lax.rsqrt(var2 + EPS) * g2 + be2

        o_ref[...] = h2n.astype(o_ref.dtype)

    return kernel


def prepare_params(params, n_head):
    """One-time weight preparation (NOT on the per-call critical path):
    head-major reshape of Wq/Wk/Wv, 1/sqrt(d_head) fold into Wq/bq, bf16 casts,
    packing of all D-sized vectors into one block."""
    D = params["wq"].shape[0]
    dh = D // n_head
    scale = 1.0 / math.sqrt(dh)
    bf16, f32 = jnp.bfloat16, jnp.float32

    def head_major(w):                        # (D, D) -> (H, D, dh)
        return w.reshape(D, n_head, dh).transpose(1, 0, 2)

    def head_bias(b):                         # (1, D) -> (H, 1, dh)
        return b.reshape(n_head, dh)[:, None, :]

    return dict(
        n_head=n_head,
        wq_h=(head_major(params["wq"]) * scale).astype(bf16),
        wk_h=head_major(params["wk"]).astype(bf16),
        wv_h=head_major(params["wv"]).astype(bf16),
        bq_h=(head_bias(params["bq"]) * scale).astype(f32),
        bk_h=head_bias(params["bk"]).astype(f32),
        bv_h=head_bias(params["bv"]).astype(f32),
        wo=params["wo"].astype(bf16),
        w1=params["w1"].astype(bf16),
        w2=params["w2"].astype(bf16),
        b1=params["b1"].astype(f32),                             # (1, Hf)
        # packed D-vectors: bo, b2, g1, be1, g2, be2
        vecs=jnp.concatenate(
            [params["bo"], params["b2"], params["g1"], params["be1"],
             params["g2"], params["be2"]], axis=0).astype(f32),  # (6, D)
    )


def encoder_layer_pallas(x, prepped, q_tile=None, kv_tile=None):
    B, S, D = x.shape
    n_head = prepped["n_head"]
    dh = D // n_head
    Hf = prepped["w1"].shape[1]

    if q_tile is None:
        # v6e (128 MiB VMEM) can profitably use 256 here; keep 128 as a safe
        # default for v7x (64 MiB) / v5e.
        q_tile = 128 if (S % 128 == 0) else S
    assert S % q_tile == 0
    nq = S // q_tile
    if kv_tile is None:
        kv_tile = 512 if (S % 512 == 0) else S
    assert S % kv_tile == 0

    bf16, f32 = jnp.bfloat16, jnp.float32
    xb = x.astype(bf16)

    # Q/K/V projected ONCE per batch element, outside the kernel, directly into
    # head-major bf16 layout (no in-kernel transposes, no per-query-tile K/V
    # recomputation).  1/sqrt(d_head) is already folded into wq_h / bq_h.
    q_hm = (jnp.einsum("bsd,hdk->bhsk", xb, prepped["wq_h"],
                       preferred_element_type=f32) + prepped["bq_h"]).astype(bf16)
    k_hm = (jnp.einsum("bsd,hdk->bhsk", xb, prepped["wk_h"],
                       preferred_element_type=f32) + prepped["bk_h"]).astype(bf16)
    v_hm = (jnp.einsum("bsd,hdk->bhsk", xb, prepped["wv_h"],
                       preferred_element_type=f32) + prepped["bv_h"]).astype(bf16)

    def const_spec(shape):
        # Constant index_map: never re-fetched across grid steps; Buffered(1)
        # avoids double-buffered weight VMEM.
        return pl.BlockSpec(shape, lambda b, qt, _n=len(shape): (0,) * _n,
                            pipeline_mode=pl.Buffered(1))

    in_specs = [
        # x query tile (f32, for residual)
        pl.BlockSpec((None, q_tile, D), lambda b, qt: (b, qt, 0)),
        # Q tile, head-major bf16
        pl.BlockSpec((None, n_head, q_tile, dh), lambda b, qt: (b, 0, qt, 0)),
        # K / V full sequence per batch, head-major bf16 (constant across qt)
        pl.BlockSpec((None, n_head, S, dh), lambda b, qt: (b, 0, 0, 0)),
        pl.BlockSpec((None, n_head, S, dh), lambda b, qt: (b, 0, 0, 0)),
        const_spec((D, D)),      # wo
        const_spec((D, Hf)),     # w1
        const_spec((Hf, D)),     # w2
        const_spec((6, D)),      # packed bo,b2,g1,be1,g2,be2
        const_spec((1, Hf)),     # b1
    ]

    return pl.pallas_call(
        _make_kernel(kv_tile),
        out_shape=jax.ShapeDtypeStruct((B, S, D), x.dtype),
        grid=(B, nq),
        in_specs=in_specs,
        out_specs=pl.BlockSpec((None, q_tile, D), lambda b, qt: (b, qt, 0)),
        compiler_params=pltpu.CompilerParams(
            dimension_semantics=("parallel", "parallel"),
            vmem_limit_bytes=64 * 1024 * 1024),
    )(x, q_hm, k_hm, v_hm,
      prepped["wo"], prepped["w1"], prepped["w2"],
      prepped["vecs"], prepped["b1"])


def encoder_layer_ref(x, params, n_head):
    """Pure-JAX f32 reference for correctness checking."""
    B, S, D = x.shape
    d_head = D // n_head
    q = x @ params["wq"] + params["bq"]
    k = x @ params["wk"] + params["bk"]
    v = x @ params["wv"] + params["bv"]

    def split(t):
        return t.reshape(B, S, n_head, d_head).transpose(0, 2, 1, 3)
    qh, kh, vh = split(q), split(k), split(v)
    s = jnp.einsum("bhqd,bhkd->bhqk", qh, kh) / math.sqrt(d_head)
    p = jax.nn.softmax(s, axis=-1)
    a = jnp.einsum("bhqk,bhkd->bhqd", p, vh)
    a = a.transpose(0, 2, 1, 3).reshape(B, S, D)
    a = a @ params["wo"] + params["bo"]

    def ln(t, g, b):
        mu = jnp.mean(t, -1, keepdims=True)
        var = jnp.mean((t - mu) ** 2, -1, keepdims=True)
        return (t - mu) * jax.lax.rsqrt(var + EPS) * g + b

    h1 = ln(x + a, params["g1"], params["be1"])
    f = jnp.maximum(h1 @ params["w1"] + params["b1"], 0.0) @ params["w2"] + params["b2"]
    return ln(h1 + f, params["g2"], params["be2"])


def init_params(key, d_model, ffn_hidden):
    ks = jax.random.split(key, 8)
    scale = 0.02

    def lin(k, din, dout):
        return (jax.random.normal(k, (din, dout), jnp.float32) * scale,
                jnp.zeros((1, dout), jnp.float32))

    wq, bq = lin(ks[0], d_model, d_model)
    wk, bk = lin(ks[1], d_model, d_model)
    wv, bv = lin(ks[2], d_model, d_model)
    wo, bo = lin(ks[3], d_model, d_model)
    w1, b1 = lin(ks[4], d_model, ffn_hidden)
    w2, b2 = lin(ks[5], ffn_hidden, d_model)
    return dict(
        wq=wq, bq=bq, wk=wk, bk=bk, wv=wv, bv=bv, wo=wo, bo=bo,
        w1=w1, b1=b1, w2=w2, b2=b2,
        g1=jnp.ones((1, d_model), jnp.float32),
        be1=jnp.zeros((1, d_model), jnp.float32),
        g2=jnp.ones((1, d_model), jnp.float32),
        be2=jnp.zeros((1, d_model), jnp.float32),
    )


if __name__ == "__main__":
    B, S, D, FFN_H, N_HEAD = 2, 16, 32, 64, 4
    key = jax.random.PRNGKey(0)
    kx, kp = jax.random.split(key)
    x = jax.random.normal(kx, (B, S, D), jnp.float32)
    params = init_params(kp, D, FFN_H)

    # One-time weight prep (head-major / bf16 / packed), off the per-call path.
    prepped = prepare_params(params, N_HEAD)
    ref = encoder_layer_ref(x, params, N_HEAD)

    # Path 1: single KV tile (direct softmax); q_tile=8 exercises (B, nq) grid.
    out_direct = jax.block_until_ready(
        encoder_layer_pallas(x, prepped, q_tile=8, kv_tile=S))
    # Path 2: KV-tiled online (flash) softmax.
    out_flash = jax.block_until_ready(
        encoder_layer_pallas(x, prepped, q_tile=8, kv_tile=8))

    assert out_direct.shape == (B, S, D)
    assert out_flash.shape == (B, S, D)
    # bf16 matmul inputs + approx reciprocal vs. f32 reference -> relaxed tol.
    assert jnp.allclose(out_direct, ref, atol=2e-2, rtol=2e-2), "direct path mismatch"
    assert jnp.allclose(out_flash, ref, atol=2e-2, rtol=2e-2), "flash path mismatch"

    print("KERNEL_OK")
</pallas_src>

<mosaic_0001>
module attributes {stable_mosaic.version = 11 : i64} {
  func.func @kernel(%arg0: i32, %arg1: i32, %arg2: memref<1x8x32xf32, #tpu.memory_space<vmem>>, %arg3: memref<1x4x8x8xbf16, #tpu.memory_space<vmem>>, %arg4: memref<1x4x16x8xbf16, #tpu.memory_space<vmem>>, %arg5: memref<1x4x16x8xbf16, #tpu.memory_space<vmem>>, %arg6: memref<32x32xbf16, #tpu.memory_space<vmem>>, %arg7: memref<32x64xbf16, #tpu.memory_space<vmem>>, %arg8: memref<64x32xbf16, #tpu.memory_space<vmem>>, %arg9: memref<6x32xf32, #tpu.memory_space<vmem>>, %arg10: memref<1x64xf32, #tpu.memory_space<vmem>>, %arg11: memref<1x8x32xf32, #tpu.memory_space<vmem>>) attributes {dimension_semantics = [#tpu.dimension_semantics<parallel>, #tpu.dimension_semantics<parallel>], iteration_bounds = array<i64: 2, 2>, scalar_prefetch = 0 : i64, scratch_operands = 0 : i64, tpu.core_type = #tpu.core_type<tc>, window_params = [{transform_indices = @transform_0, window_bounds = array<i64: 1, 8, 32>}, {transform_indices = @transform_1, window_bounds = array<i64: 1, 4, 8, 8>}, {transform_indices = @transform_2, window_bounds = array<i64: 1, 4, 16, 8>}, {transform_indices = @transform_3, window_bounds = array<i64: 1, 4, 16, 8>}, {pipeline_mode = #tpu.pipeline_mode<synchronous>, transform_indices = @transform_4, window_bounds = array<i64: 32, 32>}, {pipeline_mode = #tpu.pipeline_mode<synchronous>, transform_indices = @transform_5, window_bounds = array<i64: 32, 64>}, {pipeline_mode = #tpu.pipeline_mode<synchronous>, transform_indices = @transform_6, window_bounds = array<i64: 64, 32>}, {pipeline_mode = #tpu.pipeline_mode<synchronous>, transform_indices = @transform_7, window_bounds = array<i64: 6, 32>}, {pipeline_mode = #tpu.pipeline_mode<synchronous>, transform_indices = @transform_8, window_bounds = array<i64: 1, 64>}, {transform_indices = @transform_9, window_bounds = array<i64: 1, 8, 32>}]} {
    %c0 = arith.constant 0 : index
    %c0_0 = arith.constant 0 : index
    %c0_1 = arith.constant 0 : index
    %0 = vector.load %arg2[%c0, %c0_0, %c0_1] : memref<1x8x32xf32, #tpu.memory_space<vmem>>, vector<1x8x32xf32>
    %1 = vector.shape_cast %0 : vector<1x8x32xf32> to vector<8x32xf32>
    %c0_2 = arith.constant 0 : index
    %c0_3 = arith.constant 0 : index
    %c0_4 = arith.constant 0 : index
    %c0_5 = arith.constant 0 : index
    %2 = vector.load %arg3[%c0_2, %c0_3, %c0_4, %c0_5] : memref<1x4x8x8xbf16, #tpu.memory_space<vmem>>, vector<1x4x8x8xbf16>
    %3 = vector.shape_cast %2 : vector<1x4x8x8xbf16> to vector<4x8x8xbf16>
    %c0_6 = arith.constant 0 : index
    %c0_7 = arith.constant 0 : index
    %4 = vector.load %arg9[%c0_6, %c0_7] : memref<6x32xf32, #tpu.memory_space<vmem>>, vector<6x32xf32>
    %5 = vector.extract_strided_slice %4 {offsets = [0, 0], sizes = [1, 32], strides = [1, 1]} : vector<6x32xf32> to vector<1x32xf32>
    %6 = vector.extract_strided_slice %4 {offsets = [1, 0], sizes = [1, 32], strides = [1, 1]} : vector<6x32xf32> to vector<1x32xf32>
    %7 = vector.extract_strided_slice %4 {offsets = [2, 0], sizes = [1, 32], strides = [1, 1]} : vector<6x32xf32> to vector<1x32xf32>
    %8 = vector.extract_strided_slice %4 {offsets = [3, 0], sizes = [1, 32], strides = [1, 1]} : vector<6x32xf32> to vector<1x32xf32>
    %9 = vector.extract_strided_slice %4 {offsets = [4, 0], sizes = [1, 32], strides = [1, 1]} : vector<6x32xf32> to vector<1x32xf32>
    %10 = vector.extract_strided_slice %4 {offsets = [5, 0], sizes = [1, 32], strides = [1, 1]} : vector<6x32xf32> to vector<1x32xf32>
    %c0_8 = arith.constant 0 : index
    %c0_9 = arith.constant 0 : index
    %c0_10 = arith.constant 0 : index
    %c0_11 = arith.constant 0 : index
    %11 = vector.load %arg4[%c0_8, %c0_9, %c0_10, %c0_11] : memref<1x4x16x8xbf16, #tpu.memory_space<vmem>>, vector<1x4x16x8xbf16>
    %12 = vector.shape_cast %11 : vector<1x4x16x8xbf16> to vector<4x16x8xbf16>
    %c0_12 = arith.constant 0 : index
    %c0_13 = arith.constant 0 : index
    %c0_14 = arith.constant 0 : index
    %c0_15 = arith.constant 0 : index
    %13 = vector.load %arg5[%c0_12, %c0_13, %c0_14, %c0_15] : memref<1x4x16x8xbf16, #tpu.memory_space<vmem>>, vector<1x4x16x8xbf16>
    %14 = vector.shape_cast %13 : vector<1x4x16x8xbf16> to vector<4x16x8xbf16>
    "tpu.trace_start"() <{level = 10 : i32, message = "hqd,hkd->hqk"}> : () -> ()
    %cst = arith.constant dense<0.000000e+00> : vector<4x8x16xf32>
    %15 = tpu.matmul %3, %12, %cst {dimension_numbers = #tpu.dot_dimension_numbers<[2], [2], [1], [1], [0, 0, 0, 1, 1, 1], [0], [0]>} : vector<4x8x8xbf16>, vector<4x16x8xbf16>, vector<4x8x16xf32> -> vector<4x8x16xf32>
    "tpu.trace_stop"() : () -> ()
    %cst_16 = arith.constant dense<0xFF800000> : vector<4x8xf32>
    %16 = vector.multi_reduction <maximumf>, %15, %cst_16 [2] : vector<4x8x16xf32> to vector<4x8xf32>
    %17 = vector.shape_cast %16 : vector<4x8xf32> to vector<4x8x1xf32>
    %18 = vector.broadcast %17 : vector<4x8x1xf32> to vector<4x8x16xf32>
    %19 = arith.subf %15, %18 : vector<4x8x16xf32>
    %20 = math.exp %19 : vector<4x8x16xf32>
    %cst_17 = arith.constant dense<0.000000e+00> : vector<4x8xf32>
    %21 = vector.multi_reduction <add>, %20, %cst_17 [2] : vector<4x8x16xf32> to vector<4x8xf32>
    %22 = vector.shape_cast %21 : vector<4x8xf32> to vector<4x8x1xf32>
    %23 = arith.truncf %20 : vector<4x8x16xf32> to vector<4x8x16xbf16>
    "tpu.trace_start"() <{level = 10 : i32, message = "hqk,hkd->hqd"}> : () -> ()
    %cst_18 = arith.constant dense<0.000000e+00> : vector<4x8x8xf32>
    %24 = tpu.matmul %23, %14, %cst_18 {dimension_numbers = #tpu.dot_dimension_numbers<[2], [1], [1], [2], [0, 0, 0, 1, 1, 2], [0], [0]>} : vector<4x8x16xbf16>, vector<4x16x8xbf16>, vector<4x8x8xf32> -> vector<4x8x8xf32>
    "tpu.trace_stop"() : () -> ()
    %25 = tpu.reciprocal %22 {approx = true} : vector<4x8x1xf32> -> vector<4x8x1xf32>
    %26 = vector.broadcast %25 : vector<4x8x1xf32> to vector<4x8x8xf32>
    %27 = arith.mulf %24, %26 : vector<4x8x8xf32>
    %28 = tpu.transpose %27, [1, 0, 2] : vector<4x8x8xf32> -> vector<8x4x8xf32>
    %29 = vector.shape_cast %28 : vector<8x4x8xf32> to vector<8x32xf32>
    %30 = arith.truncf %29 : vector<8x32xf32> to vector<8x32xbf16>
    %c0_19 = arith.constant 0 : index
    %c0_20 = arith.constant 0 : index
    %31 = vector.load %arg6[%c0_19, %c0_20] : memref<32x32xbf16, #tpu.memory_space<vmem>>, vector<32x32xbf16>
    %cst_21 = arith.constant dense<0.000000e+00> : vector<8x32xf32>
    %32 = tpu.matmul %30, %31, %cst_21 {dimension_numbers = #tpu.dot_dimension_numbers<[1], [0], [0], [1], [0, 0, 1, 1], [], []>} : vector<8x32xbf16>, vector<32x32xbf16>, vector<8x32xf32> -> vector<8x32xf32>
    %33 = vector.broadcast %5 : vector<1x32xf32> to vector<8x32xf32>
    %34 = arith.addf %32, %33 : vector<8x32xf32>
    %35 = arith.addf %1, %34 : vector<8x32xf32>
    %cst_22 = arith.constant dense<0.000000e+00> : vector<8xf32>
    %36 = vector.multi_reduction <add>, %35, %cst_22 [1] : vector<8x32xf32> to vector<8xf32>
    %37 = vector.shape_cast %36 : vector<8xf32> to vector<8x1xf32>
    %cst_23 = arith.constant 3.200000e+01 : f32
    %38 = vector.broadcast %cst_23 : f32 to vector<8x1xf32>
    %39 = arith.divf %37, %38 : vector<8x1xf32>
    %40 = vector.broadcast %39 : vector<8x1xf32> to vector<8x32xf32>
    %41 = arith.subf %35, %40 : vector<8x32xf32>
    %42 = arith.mulf %41, %41 : vector<8x32xf32>
    %cst_24 = arith.constant dense<0.000000e+00> : vector<8xf32>
    %43 = vector.multi_reduction <add>, %42, %cst_24 [1] : vector<8x32xf32> to vector<8xf32>
    %44 = vector.shape_cast %43 : vector<8xf32> to vector<8x1xf32>
    %cst_25 = arith.constant 3.200000e+01 : f32
    %45 = vector.broadcast %cst_25 : f32 to vector<8x1xf32>
    %46 = arith.divf %44, %45 : vector<8x1xf32>
    %47 = vector.broadcast %39 : vector<8x1xf32> to vector<8x32xf32>
    %48 = arith.subf %35, %47 : vector<8x32xf32>
    %cst_26 = arith.constant 9.99999974E-6 : f32
    %49 = vector.broadcast %cst_26 : f32 to vector<8x1xf32>
    %50 = arith.addf %46, %49 : vector<8x1xf32>
    %51 = math.rsqrt %50 : vector<8x1xf32>
    %52 = vector.broadcast %51 : vector<8x1xf32> to vector<8x32xf32>
    %53 = arith.mulf %48, %52 : vector<8x32xf32>
    %54 = vector.broadcast %7 : vector<1x32xf32> to vector<8x32xf32>
    %55 = arith.mulf %53, %54 : vector<8x32xf32>
    %56 = vector.broadcast %8 : vector<1x32xf32> to vector<8x32xf32>
    %57 = arith.addf %55, %56 : vector<8x32xf32>
    %58 = arith.truncf %57 : vector<8x32xf32> to vector<8x32xbf16>
    %c0_27 = arith.constant 0 : index
    %c0_28 = arith.constant 0 : index
    %59 = vector.load %arg7[%c0_27, %c0_28] : memref<32x64xbf16, #tpu.memory_space<vmem>>, vector<32x64xbf16>
    %cst_29 = arith.constant dense<0.000000e+00> : vector<8x64xf32>
    %60 = tpu.matmul %58, %59, %cst_29 {dimension_numbers = #tpu.dot_dimension_numbers<[1], [0], [0], [1], [0, 0, 1, 1], [], []>} : vector<8x32xbf16>, vector<32x64xbf16>, vector<8x64xf32> -> vector<8x64xf32>
    %c0_30 = arith.constant 0 : index
    %c0_31 = arith.constant 0 : index
    %61 = vector.load %arg10[%c0_30, %c0_31] : memref<1x64xf32, #tpu.memory_space<vmem>>, vector<1x64xf32>
    %62 = vector.broadcast %61 : vector<1x64xf32> to vector<8x64xf32>
    %63 = arith.addf %60, %62 : vector<8x64xf32>
    %cst_32 = arith.constant 0.000000e+00 : f32
    %64 = vector.broadcast %cst_32 : f32 to vector<8x64xf32>
    %65 = arith.maximumf %63, %64 : vector<8x64xf32>
    %66 = arith.truncf %65 : vector<8x64xf32> to vector<8x64xbf16>
    %c0_33 = arith.constant 0 : index
    %c0_34 = arith.constant 0 : index
    %67 = vector.load %arg8[%c0_33, %c0_34] : memref<64x32xbf16, #tpu.memory_space<vmem>>, vector<64x32xbf16>
    %cst_35 = arith.constant dense<0.000000e+00> : vector<8x32xf32>
    %68 = tpu.matmul %66, %67, %cst_35 {dimension_numbers = #tpu.dot_dimension_numbers<[1], [0], [0], [1], [0, 0, 1, 1], [], []>} : vector<8x64xbf16>, vector<64x32xbf16>, vector<8x32xf32> -> vector<8x32xf32>
    %69 = vector.broadcast %6 : vector<1x32xf32> to vector<8x32xf32>
    %70 = arith.addf %68, %69 : vector<8x32xf32>
    %71 = arith.addf %57, %70 : vector<8x32xf32>
    %cst_36 = arith.constant dense<0.000000e+00> : vector<8xf32>
    %72 = vector.multi_reduction <add>, %71, %cst_36 [1] : vector<8x32xf32> to vector<8xf32>
    %73 = vector.shape_cast %72 : vector<8xf32> to vector<8x1xf32>
    %cst_37 = arith.constant 3.200000e+01 : f32
    %74 = vector.broadcast %cst_37 : f32 to vector<8x1xf32>
    %75 = arith.divf %73, %74 : vector<8x1xf32>
    %76 = vector.broadcast %75 : vector<8x1xf32> to vector<8x32xf32>
    %77 = arith.subf %71, %76 : vector<8x32xf32>
    %78 = arith.mulf %77, %77 : vector<8x32xf32>
    %cst_38 = arith.constant dense<0.000000e+00> : vector<8xf32>
    %79 = vector.multi_reduction <add>, %78, %cst_38 [1] : vector<8x32xf32> to vector<8xf32>
    %80 = vector.shape_cast %79 : vector<8xf32> to vector<8x1xf32>
    %cst_39 = arith.constant 3.200000e+01 : f32
    %81 = vector.broadcast %cst_39 : f32 to vector<8x1xf32>
    %82 = arith.divf %80, %81 : vector<8x1xf32>
    %83 = vector.broadcast %75 : vector<8x1xf32> to vector<8x32xf32>
    %84 = arith.subf %71, %83 : vector<8x32xf32>
    %cst_40 = arith.constant 9.99999974E-6 : f32
    %85 = vector.broadcast %cst_40 : f32 to vector<8x1xf32>
    %86 = arith.addf %82, %85 : vector<8x1xf32>
    %87 = math.rsqrt %86 : vector<8x1xf32>
    %88 = vector.broadcast %87 : vector<8x1xf32> to vector<8x32xf32>
    %89 = arith.mulf %84, %88 : vector<8x32xf32>
    %90 = vector.broadcast %9 : vector<1x32xf32> to vector<8x32xf32>
    %91 = arith.mulf %89, %90 : vector<8x32xf32>
    %92 = vector.broadcast %10 : vector<1x32xf32> to vector<8x32xf32>
    %93 = arith.addf %91, %92 : vector<8x32xf32>
    %c0_41 = arith.constant 0 : index
    %c0_42 = arith.constant 0 : index
    %c0_43 = arith.constant 0 : index
    %94 = vector.load %arg11[%c0_41, %c0_42, %c0_43] : memref<1x8x32xf32, #tpu.memory_space<vmem>>, vector<1x8x32xf32>
    %95 = vector.shape_cast %94 : vector<1x8x32xf32> to vector<8x32xf32>
    %96 = vector.shape_cast %93 : vector<8x32xf32> to vector<1x8x32xf32>
    tpu.vector_store %arg11[%c0_41, %c0_42, %c0_43], %96 {strides = array<i32>} : memref<1x8x32xf32, #tpu.memory_space<vmem>>, vector<1x8x32xf32>,
    return
  }
  func.func @transform_0(%arg0: i32, %arg1: i32) -> (i32, i32, i32) {
    %c0_i32 = arith.constant 0 : i32
    %c0_i32_0 = arith.constant 0 : i32
    return %arg0, %arg1, %c0_i32 : i32, i32, i32
  }
  func.func @transform_1(%arg0: i32, %arg1: i32) -> (i32, i32, i32, i32) {
    %c0_i32 = arith.constant 0 : i32
    %c0_i32_0 = arith.constant 0 : i32
    %c0_i32_1 = arith.constant 0 : i32
    return %arg0, %c0_i32, %arg1, %c0_i32_0 : i32, i32, i32, i32
  }
  func.func @transform_2(%arg0: i32, %arg1: i32) -> (i32, i32, i32, i32) {
    %c0_i32 = arith.constant 0 : i32
    %c0_i32_0 = arith.constant 0 : i32
    %c0_i32_1 = arith.constant 0 : i32
    %c0_i32_2 = arith.constant 0 : i32
    return %arg0, %c0_i32, %c0_i32_0, %c0_i32_1 : i32, i32, i32, i32
  }
  func.func @transform_3(%arg0: i32, %arg1: i32) -> (i32, i32, i32, i32) {
    %c0_i32 = arith.constant 0 : i32
    %c0_i32_0 = arith.constant 0 : i32
    %c0_i32_1 = arith.constant 0 : i32
    %c0_i32_2 = arith.constant 0 : i32
    return %arg0, %c0_i32, %c0_i32_0, %c0_i32_1 : i32, i32, i32, i32
  }
  func.func @transform_4(%arg0: i32, %arg1: i32) -> (i32, i32) {
    %c0_i32 = arith.constant 0 : i32
    %c0_i32_0 = arith.constant 0 : i32
    %c0_i32_1 = arith.constant 0 : i32
    return %c0_i32, %c0_i32_0 : i32, i32
  }
  func.func @transform_5(%arg0: i32, %arg1: i32) -> (i32, i32) {
    %c0_i32 = arith.constant 0 : i32
    %c0_i32_0 = arith.constant 0 : i32
    %c0_i32_1 = arith.constant 0 : i32
    return %c0_i32, %c0_i32_0 : i32, i32
  }
  func.func @transform_6(%arg0: i32, %arg1: i32) -> (i32, i32) {
    %c0_i32 = arith.constant 0 : i32
    %c0_i32_0 = arith.constant 0 : i32
    %c0_i32_1 = arith.constant 0 : i32
    return %c0_i32, %c0_i32_0 : i32, i32
  }
  func.func @transform_7(%arg0: i32, %arg1: i32) -> (i32, i32) {
    %c0_i32 = arith.constant 0 : i32
    %c0_i32_0 = arith.constant 0 : i32
    %c0_i32_1 = arith.constant 0 : i32
    return %c0_i32, %c0_i32_0 : i32, i32
  }
  func.func @transform_8(%arg0: i32, %arg1: i32) -> (i32, i32) {
    %c0_i32 = arith.constant 0 : i32
    %c0_i32_0 = arith.constant 0 : i32
    %c0_i32_1 = arith.constant 0 : i32
    return %c0_i32, %c0_i32_0 : i32, i32
  }
  func.func @transform_9(%arg0: i32, %arg1: i32) -> (i32, i32, i32) {
    %c0_i32 = arith.constant 0 : i32
    %c0_i32_0 = arith.constant 0 : i32
    return %arg0, %arg1, %c0_i32 : i32, i32, i32
  }
}

</mosaic_0001>

<bundles_post_ra>
// kernel: tpu_custom_call.1
= control target key start
LH: loop header
LB: loop body
LE: loop exit
PB: predicated region body
PF: predicated region fallthrough
CT: control target
= control target key end

     0   :  { %14 = vsyncpa [#allocation4], 0  ;;  %s2198_s0 = inlined_call_operand.vmem [shape: f32[2,16,32], index: 0, kind: input, shape index: {}]   ;;  %s2199_s1 = inlined_call_operand.vmem [shape: bf16[2,4,16,8], index: 1, kind: input, shape index: {}]   ;;  %s2200_s2 = inlined_call_operand.vmem [shape: bf16[2,4,16,8], index: 2, kind: input, shape index: {}]   ;;  %s2201_s3 = inlined_call_operand.vmem [shape: bf16[2,4,16,8], index: 3, kind: input, shape index: {}]   ;;  %s2202_s4 = inlined_call_operand.vmem [shape: bf16[32,32], index: 4, kind: input, shape index: {}]   ;;  %s2203_s5 = inlined_call_operand.vmem [shape: bf16[32,64], index: 5, kind: input, shape index: {}]   ;;  %s2204_s6 = inlined_call_operand.vmem [shape: bf16[64,32], index: 6, kind: input, shape index: {}]   ;;  %s2205_s7 = inlined_call_operand.vmem [shape: f32[6,32], index: 7, kind: input, shape index: {}]   ;;  %s2206_s8 = inlined_call_operand.vmem [shape: f32[1,64], index: 8, kind: input, shape index: {}]   ;;  %s2207_s9 = inlined_call_operand.hbm [shape: f32[2,16,32], index: 9, kind: output, shape index: {}]  }
   0x1   :  { %16 = vsyncpa [#allocation4 + $0x1], 0  ;;  %s1924_s30 = smov 0   ;;  %s1926_s10 = smov 0  }
   0x2   :  { %s1928_s11 = smov 0   ;;  %s1930_s12 = smov 0  }
   0x3   :  { %s1932_s13 = smov 0   ;;  %s1934_s14 = smov 0  }
   0x4   :  { %s1936_s15 = smov 0   ;;  %s1938_s16 = smov 0  }
   0x5 LB: > { %s1502_s17 = sadd.s32 4294967295, %s1864_s16   ;;  %s1503_s18 = sadd.s32 4294967294, %s1864_s16   ;;  %s1864_s16 = sphi %s1938_s16, %s22_s16   ;;  %s1860_s15 = sphi %s1936_s15, %s2226_s15   ;;  %s1856_s14 = sphi %s1934_s14, %s2225_s14   ;;  %s1852_s13 = sphi %s1932_s13, %s2224_s13   ;;  %s1848_s12 = sphi %s1930_s12, %s2223_s12   ;;  %s1844_s11 = sphi %s1928_s11, %s2222_s11   ;;  %s1840_s10 = sphi %s1926_s10, %s2221_s10   ;;  %s1836_s30 = sphi %s1924_s30, %s2220_s30  }
   0x6   : > { %s31_s19 = sadd.s32 1, %s1856_s14  ;;  %s34_s20 = sadd.s32 1, %s1860_s15 }
   0x7   : > { %p32_p0 = scmp.ge.s32.totalorder %s31_s19, 2  ;;  %p78_p1 = scmp.ne.s32.totalorder %s1844_s11, %s1840_s10 }
   0x8   : > { %p79_p2 = scmp.eq.s32.totalorder %s1864_s16, 0  ;;  %p267_p5 = scmp.eq.s32.totalorder %s1502_s17, 3 }
   0x9   : > { %s2228_s19 = smov (%p32_p0, %s31_s19), 0  ;;  %s2230_s20 = smov (!%p32_p0, %s34_s20), %s1860_s15 }
   0xa   : > { %2211 = sst [smem:[#allocation6_spill]] %s2228_s19  ;;  %s67_s21 = ssub.s32 %s1856_s14, %s2228_s19 }
   0xb   : > { %p1976_p3 = por %p79_p2, %p78_p1  ;;  %p36_p4 = scmp.ge.s32.totalorder %s2230_s20, 2 }
   0xc   : > { %p272_p6 = scmp.ne.s32.totalorder %s1840_s10, %s1836_s30  ;;  %p273_p7 = scmp.eq.s32.totalorder %s1503_s18, 3 }
   0xd   : > { %s2232_s20 = smov (%p36_p4, %s2230_s20), 0  ;;  %p1984_p8 = por %p267_p5, %p78_p1 }
   0xe   : > { %2213 = sst [smem:[#allocation7_spill]] %s2232_s20  ;;  %p1988_p9 = por %p273_p7, %p272_p6 }
   0xf   : > { %s66_s25 = ssub.s32 %s1860_s15, %s2232_s20  ;;  %s71_s27 = sadd.s32 1, %s1844_s11 }
  0x10   : > { %s2215_s24 = scalar_select %p1988_p9, 1, 0 }
  0x11   : > { %s68_s26 = sor.u32 %s67_s21, %s66_s25  ;;  %p1505_p11 = scmp.ge.s32.totalorder %s1864_s16, 4 }
  0x12   : > { %2216 = sst [smem:[#allocation8_spill]] %s2215_s24  ;;  %p69_p10 = scmp.eq.s32.totalorder %s68_s26, 0 }
  0x13   : > { %304 = sbr.rel (%p1505_p11) target bundleno = 32 (0x20), region = 36 }
  0x14   : > { %s1996_s28 = scalar_select %p69_p10, %s1844_s11, %s71_s27  }
  0x18   : > { %318 = sbr.rel (!%p1976_p3) target bundleno = 32 (0x20), region = 44  ;;  %s320_s29 = sand.u32 (%p1976_p3), 1, %s1844_s11  }
  0x19   : > { %s1507_s17 = sshll.u32 (%p1976_p3), %s1860_s15, 3  ;;  %s1506_s18 = sshll.u32 (%p1976_p3), %s320_s29, 4 }
  0x1a   : > { %s324_s19 = sadd.s32 (%p1976_p3), %s1856_s14, %s1507_s17  ;;  %s322_s26 = scalar_lea.vmem (%p1976_p3), [#allocation2], %s1506_s18 }
  0x1b   : > { %s1508_s24 = sshll.u32 (%p1976_p3), %s324_s19, 2 }
  0x1c   : > { %s326_s25 = scalar_lea.vmem (%p1976_p3), %s2199_s1, %s1508_s24 }
  0x1d   : > { %v343_v0 = vld [vmem:[%s326_s25] sm:$0xf]  ;;  %v345_v1 = vld [vmem:[%s326_s25 + $0x8] sm:$0xf]  ;;  %v347_v2 = vld [vmem:[%s326_s25 + $0x10] sm:$0xf] }
  0x1e   : > { %344 = vst [vmem:[%s322_s26] sm:$0xf] %v343_v0  ;;  %346 = vst [vmem:[%s322_s26 + $0x4] sm:$0xf] %v345_v1  ;;  %v349_v3 = vld [vmem:[%s326_s25 + $0x18] sm:$0xf] }
  0x1f   : > { %348 = vst [vmem:[%s322_s26 + $0x8] sm:$0xf] %v347_v2  ;;  %350 = vst [vmem:[%s322_s26 + $0xc] sm:$0xf] %v349_v3 }
  0x20 PF: > { %p1509_p12 = scmp.ge.s32.totalorder %s1864_s16, 1  ;;  %p397_p13 = scmp.lt.s32.totalorder %s1864_s16, 5 }
  0x22   : > { %p398_p0 = pnand %p1509_p12, %p397_p13 }
  0x23   : > { %p457_p1 = scmp.lt.s32.totalorder (!%p398_p0), %s1852_s13, 1  ;;  %s2013_s19 = sand.u32 (!%p398_p0), 1, %s1840_s10  }
  0x24   : > { %401 = sbr.rel (%p398_p0) target bundleno = 1981 (0x7bd), region = 93  ;;  %s1510_s24 = sshll.u32 (!%p398_p0), %s2013_s19, 4 }
  0x25   : > { %s406_s26 = scalar_lea.vmem (!%p398_p0), [#allocation2], %s1510_s24  ;;  %s1871_s18 = smov (!%p398_p0), 8  }
  0x26   : > { %s1872_s21 = smov (!%p398_p0), 24   ;;  %p459_p2 = scmp.lt.s32.totalorder (!%p398_p0), %s1848_s12, 1 }
  0x27   : > { %s1511_s24 = sshll.u32 (!%p398_p0), %s2013_s19, 3  ;;  %s1549_s27 = sshll.u32 (!%p398_p0), %s1852_s13, 1 }
  0x29   : > { %v1866_v4 = vmov 0.0   ;;  %s2016_s20 = scalar_select %p457_p1, %s1852_s13, 1  ;;  %vm1867_vm0 = vmmov 0   ;;  %vm503_vm1 = vcmask 64512   ;;  %v477_v10 = vld [vmem:[%s406_s26] sm:$0xf] }
  0x2a   : > { %1582 = vmatprep.subr.bf16.mxu1 %v1866_v4  ;;  %1594 = vmatprep.subr.bf16.mxu0 %v1866_v4  ;;  %v479_v12 = vld [vmem:[%s406_s26 + $0x8] sm:$0xf]  ;;  %v478_v14 = vld [vmem:[%s406_s26 + $0x4] sm:$0xf]  ;;  %v480_v16 = vld [vmem:[%s406_s26 + $0xc] sm:$0xf] }
  0x2b   : > { %1584 = vmatprep.mubr.msk.bf16.mxu1 %vm1867_vm0, %v1866_v4  ;;  %1596 = vmatprep.mubr.msk.bf16.mxu0 %vm1867_vm0, %v1866_v4  ;;  %s1553_s22 = sshll.u32 %s2016_s20, 5  ;;  %vm703_vm2 = vcmask 130048   ;;  %vm1098_vm3 = vcmask 195584   ;;  %vm1121_vm4 = vcmask 261120   ;;  %s1512_s26 = sshll.u32 %s2016_s20, 1  ;;  %vm1295_vm5 = vcmask 523264  }
  0x2c   : > { %s469_s17 = scalar_lea.vmem %s2200_s2, %s1553_s22  ;;  %s2031_s25 = scalar_lea.vmem %s2201_s3, %s1553_s22 }
  0x2d   : > { %v1736_v5 = vld [vmem:[%s469_s17] sm:$0xff]   ;;  %v1737_v6 = vld [vmem:[%s469_s17 + $0x10] sm:$0xff]   ;;  %v1738_v8 = vld [vmem:[%s469_s17 + $0x8] sm:$0xff]   ;;  %s1365_s13 = scalar_lea.sflag [#allocation4], %s2013_s19 }
  0x2e   : > { %v508_v7 = vsel %vm503_vm1, %v1736_v5, 0  ;;  %v610_v9 = vsel %vm503_vm1, %v1737_v6, 0  ;;  %v559_v11 = vsel %vm503_vm1, %v1738_v8, 0  ;;  %v1739_v13 = vld [vmem:[%s469_s17 + $0x18] sm:$0xff]   ;;  %v1740_v37 = vld [vmem:[%s2031_s25] sm:$0xff]   ;;  %v1741_v38 = vld [vmem:[%s2031_s25 + $0x8] sm:$0xff]  }
  0x2f   : > { %1583 = vmatpush3.bf16.xpose.msra.mxu1 %v508_v7  ;;  %1595 = vmatpush3.bf16.xpose.msra.mxu0 %v610_v9  ;;  %v661_v15 = vsel %vm503_vm1, %v1739_v13, 0  ;;  %v1742_v51 = vld [vmem:[%s2031_s25 + $0x10] sm:$0xff]   ;;  %v1743_v58 = vld [vmem:[%s2031_s25 + $0x18] sm:$0xff]   ;;  %s1870_s17 = smov 16  }
  0x30   : > { %1588 = vmatprep.subr.bf16.mxu1 %v1866_v4  ;;  %1606 = vmatprep.subr.bf16.mxu0 %v1866_v4  ;;  %s460_s25 = scalar_select %p459_p2, %s1848_s12, 1 }
  0x32   : > { %s462_s22 = sadd.s32 %s1512_s26, %s460_s25 }
  0x33   : > { %s1513_s29 = sshll.u32 %s462_s22, 3 }
  0x36   : > { %1585 = vmatmul.mubr.msk.bf16.vlgmr.msra.gmra.mxu1 %vm503_vm1, %v477_v10  ;;  %1597 = vmatmul.mubr.msk.bf16.vlgmr.msra.gmra.mxu0 %vm503_vm1, %v479_v12  ;;  %v1868_v12 = vmov 1983009808  }
  0x37   : > { %1589 = vmatpush3.bf16.xpose.msra.mxu1 %v559_v11  ;;  %1590 = vmatprep.mubr.msk.bf16.mxu1 %vm1867_vm0, %v1866_v4  ;;  %v951_v13 = vunpack.c.l.s4 %v1868_v12 }
  0x38   : > { %1600 = vmatprep.subr.bf16.mxu1 %v1866_v4  ;;  %1608 = vmatprep.mubr.msk.bf16.mxu0 %vm1867_vm0, %v1866_v4 }
  0x39   : > { %1607 = vmatpush3.bf16.msra.mxu0 %v1740_v37 }
  0x3a   : > { %1618 = vmatprep.subr.bf16.mxu0 %v1866_v4 }
  0x3e   : > { %1591 = vmatmul.mubr.msk.bf16.vlgmr.msra.gmra.mxu1 %vm503_vm1, %v478_v14  ;;  %v953_v14 = vlaneseq }
  0x3f   : > { %1601 = vmatpush3.bf16.xpose.msra.mxu1 %v661_v15  ;;  %1602 = vmatprep.mubr.msk.bf16.mxu1 %vm1867_vm0, %v1866_v4 }
  0x40   : > { %1612 = vmatprep.subr.bf16.mxu1 %v1866_v4 }
  0x46   : > { %1603 = vmatmul.mubr.msk.bf16.vlgmr.msra.gmra.mxu1 %vm503_vm1, %v480_v16 }
  0x47   : > { %1614 = vmatprep.mubr.msk.bf16.mxu1 %vm1867_vm0, %v1866_v4  ;;  %1613 = vmatpush3.bf16.msra.mxu1 %v1741_v38 }
  0x48   : > { %1624 = vmatprep.subr.bf16.mxu1 %v1866_v4 }
  0xf6   : > { %v544_v17 = vpop.f32.mrf.mxu1  ;;  %v646_v18 = vpop.f32.mrf.mxu0 }
  0xf7   : > { %v704_v19 = vsel %vm703_vm2, %v544_v17, -inf  ;;  %v710_v20 = vsel %vm703_vm2, %v646_v18, -inf }
  0xf8   : > { %705 = vmax.xlane.f32.xlu0 %v704_v19  ;;  %v1586_v21 = vpop.f32.mrf.mxu1  ;;  %711 = vmax.xlane.f32.xlu1 %v710_v20  ;;  %v1598_v22 = vpop.f32.mrf.mxu0  ;;  %v2080_v19 = vshrl.u32 %v953_v14, 7 }
  0xf9   : > { %v1869_v22 = vmov 1934713408  }
  0xfa   : > { %v547_v23 = vpop.f32.mrf.mxu1  ;;  %v649_v24 = vpop.f32.mrf.mxu0 }
  0xfb   : > { %v983_v23 = vunpack.c.l.s4 %v1869_v22 }
  0xfc   : > { %v1587_v25 = vpop.f32.mrf.mxu1  ;;  %v1599_v26 = vpop.f32.mrf.mxu0 }
  0xfe   : > { %v595_v27 = vpop.f32.mrf.mxu1 }
  0xff   : > { %v707_v28 = vsel %vm703_vm2, %v595_v27, -inf }
 0x100   : > { %708 = vmax.xlane.f32.xlu0 %v707_v28  ;;  %v1592_v29 = vpop.f32.mrf.mxu1 }
 0x102   : > { %v598_v30 = vpop.f32.mrf.mxu1 }
 0x104   : > { %v1593_v31 = vpop.f32.mrf.mxu1 }
 0x106   : > { %v697_v32 = vpop.f32.mrf.mxu1 }
 0x107   : > { %v713_v33 = vsel %vm703_vm2, %v697_v32, -inf }
 0x108   : > { %714 = vmax.xlane.f32.xlu1 %v713_v33  ;;  %v1604_v34 = vpop.f32.mrf.mxu1  ;;  %v984_v33 = vunpack.c.0.s8 %v983_v23  ;;  %v1107_v23 = vsub.s32 0, %v2080_v19 }
 0x10a   : > { %v700_v35 = vpop.f32.mrf.mxu1 }
 0x10c   : > { %v1605_v36 = vpop.f32.mrf.mxu1 }
 0x181   : > { %v706_v39 = vpop.xlane.xlu0 %705  ;;  %v712_v40 = vpop.xlane.xlu1 %711 }
 0x182   : > { %v716_v41 = vsub.f32 %v544_v17, %v706_v39  ;;  %v718_v42 = vsub.f32 %v646_v18, %v712_v40  ;;  %v952_v18 = vunpack.c.0.s8 %v951_v13 }
 0x184   : > { %v720_v43 = vmul.f32 1.442695, %v716_v41  ;;  %v724_v44 = vmul.f32 1.442695, %v718_v42  ;;  %v955_v31 = vsub.s32 %v952_v18, %v2080_v19  ;;  %v987_v41 = vsub.s32 %v984_v33, %v2080_v19 }
 0x186   : > { %1752 = vpow2.f32 %v720_v43 }
 0x187   : > { %1754 = vpow2.f32 %v724_v44 }
 0x189   : > { %v709_v45 = vpop.xlane.xlu0 %708 }
 0x18a   : > { %v717_v46 = vsub.f32 %v595_v27, %v709_v45 }
 0x18c   : > { %v722_v47 = vmul.f32 1.442695, %v717_v46 }
 0x18e   : > { %1756 = vpow2.f32 %v722_v47 }
 0x191   : > { %v715_v48 = vpop.xlane.xlu1 %714 }
 0x192   : > { %v719_v49 = vsub.f32 %v697_v32, %v715_v48 }
 0x193   : > { %v1753_v50 = vpop.eup %1752 }
 0x194   : > { %v726_v52 = vmul.f32 1.442695, %v719_v49  ;;  %v728_v53 = vsel %vm703_vm2, %v1753_v50, 0.0  ;;  %v740_v54 = vpack.c.bf16 %v1753_v50, %v1753_v50  ;;  %v1755_v55 = vpop.eup %1754 }
 0x195   : > { %729 = vadd.xlane.f32.xlu0 %v728_v53  ;;  %v734_v56 = vsel %vm703_vm2, %v1755_v55, 0.0  ;;  %v742_v61 = vpack.c.bf16 %v1755_v55, %v1755_v55 }
 0x196   : > { %1758 = vpow2.f32 %v726_v52  ;;  %1609 = vmatmul.mubr.msk.bf16.vlgmr.msra.gmra.mxu0 %vm703_vm2, %v740_v54  ;;  %v1744_v52 = vld [vmem:[%s2202_s4 + $0x8] sm:$0xff]  }
 0x197   : > { %1619 = vmatpush3.bf16.msra.mxu0 %v1742_v51  ;;  %1620 = vmatprep.mubr.msk.bf16.mxu0 %vm1867_vm0, %v1866_v4 }
 0x198   : > { %1630 = vmatprep.subr.bf16.mxu0 %v1866_v4 }
 0x199   : > { %735 = vadd.xlane.f32.xlu0 %v734_v56 }
 0x19b   : > { %v1757_v57 = vpop.eup %1756 }
 0x19c   : > { %v731_v59 = vsel %vm703_vm2, %v1757_v57, 0.0  ;;  %v741_v60 = vpack.c.bf16 %v1757_v57, %v1757_v57 }
 0x19d   : > { %732 = vadd.xlane.f32.xlu1 %v731_v59 }
 0x19e   : > { %1615 = vmatmul.mubr.msk.bf16.vlgmr.msra.gmra.mxu1 %vm703_vm2, %v741_v60  ;;  %1621 = vmatmul.mubr.msk.bf16.vlgmr.msra.gmra.mxu0 %vm703_vm2, %v742_v61  ;;  %v1745_v61 = vld [vmem:[%s2202_s4] sm:$0xff]  }
 0x19f   : > { %1625 = vmatpush3.bf16.msra.mxu1 %v1743_v58  ;;  %1626 = vmatprep.mubr.msk.bf16.mxu1 %vm1867_vm0, %v1866_v4 }
 0x1a0   : > { %1634 = vmatprep.mubr.msk.bf16.mxu0 %vm1867_vm0, %v1866_v4  ;;  %1638 = vmatprep.subr.bf16.mxu1 %v1866_v4 }
 0x1a1   : > { %1631 = vmatpush3.bf16.msra.mxu0 %v1744_v52 }
 0x1a2   : > { %1632 = vmatprep.subr.bf16.mxu0 %v1866_v4 }
 0x1a3   : > { %v1759_v62 = vpop.eup %1758 }
 0x1a4   : > { %v737_v63 = vsel %vm703_vm2, %v1759_v62, 0.0  ;;  %v743_v0 = vpack.c.bf16 %v1759_v62, %v1759_v62 }
 0x1a5   : > { %738 = vadd.xlane.f32.xlu1 %v737_v63  ;;  %1633 = vmatpush3.bf16.msra.mxu0 %v1745_v61 }
 0x1a6   : > { %1627 = vmatmul.mubr.msk.bf16.vlgmr.msra.gmra.mxu1 %vm703_vm2, %v743_v0  ;;  %1646 = vmatprep.subr.bf16.mxu0 %v1866_v4 }
 0x1a7   : > { %1642 = vmatprep.mubr.msk.bf16.mxu1 %vm1867_vm0, %v1866_v4 }
 0x21e   : > { %v730_v1 = vpop.xlane.xlu0 %729 }
 0x222   : > { %v736_v2 = vpop.xlane.xlu0 %735 }
 0x223   : > { %1760 = vrcp.f32 %v736_v2 }
 0x224   : > { %1762 = vrcp.f32 %v730_v1 }
 0x226   : > { %v733_v3 = vpop.xlane.xlu1 %732 }
 0x227   : > { %1764 = vrcp.f32 %v733_v3 }
 0x22e   : > { %v739_v5 = vpop.xlane.xlu1 %738 }
 0x22f   : > { %1766 = vrcp.f32 %v739_v5 }
 0x230   : > { %v1761_v17 = vpop.eup %1760 }
 0x231   : > { %v1763_v25 = vpop.eup %1762 }
 0x234   : > { %v1765_v28 = vpop.eup %1764 }
 0x23c   : > { %v1767_v30 = vpop.eup %1766 }
 0x256   : > { %v787_v6 = vpop.f32.mrf.mxu0 }
 0x257   : > { %v944_v29 = vmul.f32 %v1763_v25, %v787_v6 }
 0x258   : > { %v1610_v7 = vpop.f32.mrf.mxu0 }
 0x25a   : > { %v790_v8 = vpop.f32.mrf.mxu0 }
 0x25c   : > { %v1611_v9 = vpop.f32.mrf.mxu0 }
 0x25e   : > { %v836_v10 = vpop.f32.mrf.mxu1  ;;  %v885_v11 = vpop.f32.mrf.mxu0 }
 0x25f   : > { %v946_v24 = vmul.f32 %v1761_v17, %v885_v11  ;;  %v945_v34 = vmul.f32 %v1765_v28, %v836_v10 }
 0x260   : > { %v1616_v15 = vpop.f32.mrf.mxu1  ;;  %v1622_v16 = vpop.f32.mrf.mxu0 }
 0x261   : > { %v948_v35 = vcombine.low %v944_v29, %v946_v24  ;;  %v949_v36 = vcombine.high %v944_v29, %v946_v24  ;;  %v2104_v24 = vld [vmem:[%s2205_s7] sm:$0x3f] }
 0x262   : > { %v839_v20 = vpop.f32.mrf.mxu1  ;;  %v888_v21 = vpop.f32.mrf.mxu0  ;;  %v1108_v25 = vrot.slane %v2104_v24, %v1107_v23 }
 0x263   : > { %v956_v43 = vrot.slane %v948_v35, %v955_v31  ;;  %v963_v44 = vrot.slane %v949_v36, %v955_v31 }
 0x264   : > { %v1617_v26 = vpop.f32.mrf.mxu1  ;;  %v1623_v27 = vpop.f32.mrf.mxu0 }
 0x266   : > { %v934_v32 = vpop.f32.mrf.mxu1 }
 0x267   : > { %v947_v37 = vmul.f32 %v1767_v30, %v934_v32 }
 0x268   : > { %v1628_v38 = vpop.f32.mrf.mxu1 }
 0x269   : > { %v964_v39 = vcombine.low %v945_v34, %v947_v37  ;;  %v965_v40 = vcombine.high %v945_v34, %v947_v37 }
 0x26a   : > { %v937_v42 = vpop.f32.mrf.mxu1 }
 0x26b   : > { %v972_v45 = vrot.slane %v964_v39, %v955_v31  ;;  %v979_v46 = vrot.slane %v965_v40, %v955_v31  ;;  %v1746_v39 = vld [vmem:[%s2203_s5 + $0x8] sm:$0xff]   ;;  %v1747_v40 = vld [vmem:[%s2203_s5] sm:$0xff]   ;;  %v1749_v42 = vld [vmem:[%s2204_s6 + $0x10] sm:$0xff]  }
 0x26c   : > { %v1629_v47 = vpop.f32.mrf.mxu1  ;;  %1639 = vmatpush3.bf16.msra.mxu1 %v1746_v39 }
 0x26d   : > { %v980_v48 = vcombine.low %v956_v43, %v972_v45  ;;  %v981_v49 = vcombine.high %v956_v43, %v972_v45  ;;  %v996_v50 = vcombine.low %v963_v44, %v979_v46  ;;  %v997_v51 = vcombine.high %v963_v44, %v979_v46  ;;  %1640 = vmatprep.subr.bf16.mxu1 %v1866_v4 }
 0x26e   : > { %v1182_v46 = vsub.s32 2, %v2080_v19  ;;  %v1187_v47 = vsub.s32 3, %v2080_v19 }
 0x26f   : > { %v988_v53 = vrot.slane %v980_v48, %v987_v41  ;;  %v995_v54 = vrot.slane %v981_v49, %v987_v41  ;;  %v1004_v55 = vrot.slane %v996_v50, %v987_v41  ;;  %v1011_v56 = vrot.slane %v997_v51, %v987_v41 }
 0x270   : > { %1641 = vmatpush3.bf16.msra.mxu1 %v1747_v40  ;;  %v1183_v48 = vrot.slane %v2104_v24, %v1182_v46  ;;  %v1188_v51 = vrot.slane %v2104_v24, %v1187_v47 }
 0x271   : > { %v1016_v57 = vcombine.low %v988_v53, %v995_v54  ;;  %v1534_v58 = vcombine.high %v988_v53, %v995_v54  ;;  %v1032_v59 = vcombine.low %v1004_v55, %v1011_v56  ;;  %v1535_v60 = vcombine.high %v1004_v55, %v1011_v56  ;;  %v1750_v55 = vld [vmem:[%s2204_s6 + $0x8] sm:$0xff]   ;;  %v1751_v56 = vld [vmem:[%s2204_s6] sm:$0xff]  }
 0x273   : > { %v1023_v62 = vrot.slane %v1016_v57, %v955_v31  ;;  %v1031_v63 = vrot.slane %v1534_v58, %v955_v31  ;;  %v1039_v0 = vrot.slane %v1032_v59, %v955_v31  ;;  %v1047_v1 = vrot.slane %v1535_v60, %v955_v31  ;;  %v1539_v57 = vld [vmem:[%s2206_s8] ss:$0 sm:$0xff] }
 0x275   : > { %v1049_v2 = vcombine.high %v1023_v62, %v1031_v63  ;;  %v1065_v3 = vcombine.high %v1039_v0, %v1047_v1  ;;  %v1048_v5 = vcombine.low %v1023_v62, %v1031_v63  ;;  %v1064_v6 = vcombine.low %v1039_v0, %v1047_v1 }
 0x277   : > { %v1063_v7 = vrot.slane %v1049_v2, %v987_v41  ;;  %v1079_v8 = vrot.slane %v1065_v3, %v987_v41  ;;  %v1056_v9 = vrot.slane %v1048_v5, %v987_v41  ;;  %v1072_v10 = vrot.slane %v1064_v6, %v987_v41  ;;  %v1748_v41 = vld [vmem:[%s2204_s6 + $0x18] sm:$0xff]  }
 0x279   : > { %v1082_v11 = vcombine.low %v1063_v7, %v1079_v8  ;;  %v1081_v12 = vcombine.high %v1056_v9, %v1072_v10  ;;  %v1080_v13 = vcombine.low %v1056_v9, %v1072_v10  ;;  %v1083_v14 = vcombine.high %v1063_v7, %v1079_v8 }
 0x27b   : > { %1089 = vrot.lane.b32.xlu1 %v1082_v11, %s1870_s17  ;;  %1085 = vrot.lane.b32.xlu0 %v1081_v12, %s1871_s18  ;;  %s456_s18 = scalar_lea.vmem [#allocation3], %s1511_s24 }
 0x27f   : > { %1093 = vrot.lane.b32.xlu1 %v1083_v14, %s1872_s21  ;;  %s464_s21 = scalar_lea.vmem %s2198_s0, %s1513_s29  ;;  %s1376_s29 = sadd.s32 %s1848_s12, %s1549_s27 }
 0x280   : > { %v476_v27 = vld [vmem:[%s464_s21] sm:$0xff]  ;;  %s1550_s17 = sshll.u32 %s1376_s29, 7  ;;  %s1380_s21 = sshll.u32 %s456_s18, 4  ;;  %s1381_s21 = int_to_ptr.vmem [resolvable:$true] %s1380_s21 }
 0x281   : > { %s1378_s26 = scalar_lea.hbm %s2207_s9, %s1550_s17  ;;  %s1772_s22 = scalar_lea.vmem %s1381_s21, 128 }
 0x282   : > { %p1773_p3 = scmp.ne.s32.totalorder %s1381_s21, %s1772_s22  ;;  %s1873_s12 = smov [#allocation3]  }
 0x283   : > { %s1776_s27 = sshll.u32 %s1873_s12, 4  ;;  %s1777_s27 = int_to_ptr.vmem [resolvable:$false] %s1776_s27 }
 0x284   : > { %p1774_p4 = pnand %p1773_p3, %p1984_p8  ;;  %s1778_s24 = scalar_lea.vmem %s1777_s27, 256 }
 0x285   : > { %p1779_p6 = scmp.lt.s32.totalorder %s1381_s21, %s1777_s27  ;;  %p1780_p7 = scmp.lt.s32.totalorder %s1778_s24, %s1772_s22 }
 0x286   : > { %p1775_p5 = pneg %p1774_p4 }
 0x287   : > { %p1781_p10 = por %p1780_p7, %p1779_p6 }
 0x289   : > { %p1782_p11 = pnand %p1781_p10, %p1775_p5 }
 0x2ed   : > { %v1090_v15 = vpop.permute.xlu1 %1089  ;;  %v1086_v16 = vpop.permute.xlu0 %1085 }
 0x2ee   : > { %v1096_v17 = vsel %vm503_vm1, %v1080_v13, %v1086_v16 }
 0x2ef   : > { %v1097_v20 = vsel %vm703_vm2, %v1096_v17, %v1090_v15 }
 0x2f1   : > { %v1094_v18 = vpop.permute.xlu1 %1093 }
 0x2f2   : > { %v1099_v21 = vsel %vm1098_vm3, %v1097_v20, %v1094_v18  ;;  %v1355_v18 = vsub.s32 4, %v2080_v19  ;;  %v1360_v20 = vsub.s32 5, %v2080_v19 }
 0x2f3   : > { %v1100_v22 = vpack.c.bf16 %v1099_v21, %v1099_v21 }
 0x2f4   : > { %v1356_v21 = vrot.slane %v2104_v24, %v1355_v18 }
 0x2f5   : > { %1635 = vmatmul.mubr.msk.bf16.vlgmr.msra.gmra.mxu0 %vm1121_vm4, %v1100_v22 }
 0x2f6   : > { %1654 = vmatprep.mubr.msk.bf16.mxu0 %vm1867_vm0, %v1866_v4  ;;  %1647 = vmatpush3.bf16.msra.mxu0 %v1748_v41 }
 0x2f7   : > { %1648 = vmatprep.subr.bf16.mxu0 %v1866_v4 }
 0x2fa   : > { %1649 = vmatpush3.bf16.msra.mxu0 %v1749_v42 }
 0x2fb   : > { %1650 = vmatprep.subr.bf16.mxu0 %v1866_v4 }
 0x2fe   : > { %1651 = vmatpush3.bf16.msra.mxu0 %v1750_v55 }
 0x2ff   : > { %1652 = vmatprep.subr.bf16.mxu0 %v1866_v4  ;;  %v1269_v4 = vsub.s32 1, %v2080_v19 }
 0x301   : > { %v1270_v1 = vrot.slane %v2104_v24, %v1269_v4 }
 0x302   : > { %1653 = vmatpush3.bf16.msra.mxu0 %v1751_v56 }
 0x3b5   : > { %v1159_v26 = vpop.f32.mrf.mxu0 }
 0x3b6   : > { %v1160_v28 = vadd.f32 %v1159_v26, %v1108_v25  ;;  %v1361_v25 = vrot.slane %v2104_v24, %v1360_v20 }
 0x3b7   : > { %v1636_v29 = vpop.f32.mrf.mxu0 }
 0x3b8   : > { %v1165_v30 = vadd.f32 %v1160_v28, %v476_v27 }
 0x3b9   : > { %v1162_v31 = vpop.f32.mrf.mxu0 }
 0x3ba   : > { %v1166_v32 = vsel %vm1121_vm4, %v1165_v30, 0.0 }
 0x3bb   : > { %1167 = vadd.xlane.f32.xlu1 %v1166_v32  ;;  %v1637_v33 = vpop.f32.mrf.mxu0 }
 0x444   : > { %v1168_v34 = vpop.xlane.xlu1 %1167 }
 0x445   : > { %v1170_v35 = vmul.f32 0.03125, %v1168_v34 }
 0x447   : > { %v1171_v36 = vsub.f32 %v1165_v30, %v1170_v35 }
 0x449   : > { %v1172_v37 = vmul.f32 %v1171_v36, %v1171_v36 }
 0x44b   : > { %v1173_v38 = vsel %vm1121_vm4, %v1172_v37, 0.0 }
 0x44c   : > { %1174 = vadd.xlane.f32.xlu0 %v1173_v38 }
 0x4d5   : > { %v1175_v43 = vpop.xlane.xlu0 %1174 }
 0x4d6   : > { %v1176_v44 = vmul.f32 0.03125, %v1175_v43 }
 0x4d8   : > { %v1177_v45 = vadd.f32 1e-05, %v1176_v44 }
 0x4da   : > { %1768 = vrsqrt.f32 %v1177_v45 }
 0x4e7   : > { %v1769_v49 = vpop.eup %1768 }
 0x4e8   : > { %v1179_v50 = vmul.f32 %v1769_v49, %v1171_v36 }
 0x4ea   : > { %v1184_v52 = vmul.f32 %v1183_v48, %v1179_v50 }
 0x4ec   : > { %v1189_v53 = vadd.f32 %v1188_v51, %v1184_v52 }
 0x4ee   : > { %v1190_v54 = vpack.c.bf16 %v1189_v53, %v1189_v53 }
 0x4f0   : > { %1643 = vmatmul.mubr.msk.bf16.vlgmr.msra.gmra.mxu1 %vm1121_vm4, %v1190_v54 }
 0x5b0   : > { %v1251_v58 = vpop.f32.mrf.mxu1 }
 0x5b1   : > { %v1252_v59 = vadd.f32 %v1539_v57, %v1251_v58 }
 0x5b2   : > { %v1644_v60 = vpop.f32.mrf.mxu1 }
 0x5b3   : > { %v1257_v61 = vmax.f32 %v1252_v59, 0.0 }
 0x5b4   : > { %v1254_v62 = vpop.f32.mrf.mxu1 }
 0x5b5   : > { %v1258_v63 = vpack.c.bf16 %v1257_v61, %v1257_v61 }
 0x5b6   : > { %v1645_v0 = vpop.f32.mrf.mxu1 }
 0x5b7   : > { %1655 = vmatmul.mubr.msk.bf16.vlgmr.msra.gmra.mxu0 %vm1295_vm5, %v1258_v63 }
 0x677   : > { %v1333_v2 = vpop.f32.mrf.mxu0 }
 0x678   : > { %v1334_v3 = vadd.f32 %v1333_v2, %v1270_v1 }
 0x679   : > { %v1656_v5 = vpop.f32.mrf.mxu0 }
 0x67a   : > { %v1339_v6 = vadd.f32 %v1334_v3, %v1189_v53 }
 0x67b   : > { %v1336_v7 = vpop.f32.mrf.mxu0 }
 0x67c   : > { %v1340_v8 = vsel %vm1121_vm4, %v1339_v6, 0.0 }
 0x67d   : > { %1341 = vadd.xlane.f32.xlu0 %v1340_v8  ;;  %v1657_v9 = vpop.f32.mrf.mxu0 }
 0x706   : > { %v1342_v10 = vpop.xlane.xlu0 %1341 }
 0x707   : > { %v1343_v11 = vmul.f32 0.03125, %v1342_v10 }
 0x709   : > { %v1344_v12 = vsub.f32 %v1339_v6, %v1343_v11 }
 0x70b   : > { %v1345_v13 = vmul.f32 %v1344_v12, %v1344_v12 }
 0x70d   : > { %v1346_v14 = vsel %vm1121_vm4, %v1345_v13, 0.0 }
 0x70e   : > { %1347 = vadd.xlane.f32.xlu0 %v1346_v14 }
 0x797   : > { %v1348_v15 = vpop.xlane.xlu0 %1347 }
 0x798   : > { %v1349_v16 = vmul.f32 0.03125, %v1348_v15 }
 0x79a   : > { %v1350_v17 = vadd.f32 1e-05, %v1349_v16 }
 0x79c   : > { %1770 = vrsqrt.f32 %v1350_v17 }
 0x7a9   : > { %v1771_v22 = vpop.eup %1770 }
 0x7aa   : > { %v1352_v23 = vmul.f32 %v1771_v22, %v1344_v12 }
 0x7ac   : > { %v1357_v26 = vmul.f32 %v1356_v21, %v1352_v23 }
 0x7ae   : > { %v1362_v27 = vadd.f32 %v1361_v25, %v1357_v26 }
 0x7b0   : > { %1363 = vst.msk [vmem:[%s456_s18] sm:$0xff] %vm1121_vm4, %v1362_v27 }
 0x7b1   : > { %1785 = shalt.err (!%p1782_p11)
}
 0x7b2   : > { %s1786_s29 = scalar_lea.hbm %s1378_s26, 128  ;;  %s1790_s18 = scalar_lea.hbm %s2207_s9, 512 }
 0x7b3   : > { %p1787_p12 = scmp.ne.s32.totalorder %s1378_s26, %s1786_s29  ;;  %p1791_p1 = scmp.lt.s32.totalorder %s1378_s26, %s2207_s9 }
 0x7b4   : > { %p1792_p2 = scmp.lt.s32.totalorder %s1790_s18, %s1786_s29 }
 0x7b5   : > { %p1788_p13 = pnand %p1787_p12, %p1984_p8 }
 0x7b6   : > { %p1793_p3 = por %p1792_p2, %p1791_p1 }
 0x7b7   : > { %p1789_p0 = pneg %p1788_p13 }
 0x7b9   : > { %p1794_p4 = pnand %p1793_p3, %p1789_p0 }
 0x7bb   : > { %1797 = shalt.err (!%p1794_p4)
}
 0x7bc   : > { %1658 = dma.vmem_to_hbm [thread:$0]  (%p1984_p8), %s1381_s21, 128, %s1378_s26, %s1365_s13  }
 0x7bd PF: > { %p1664_p5 = scmp.ge.s32.totalorder %s1864_s16, 2  ;;  %s1392_s12 = sand.u32 1, %s1836_s30  }
 0x7be   : > { %s1393_s27 = scalar_lea.sflag [#allocation4], %s1392_s12 }
 0x7bf   : > { %p1661_p6 = pnand %p1664_p5, %p1988_p9 }
 0x7c1   : > { %p1662_p7 = pneg %p1661_p6 }
 0x7c3   : > { %1831 = dma.done.wait (%p1662_p7), %s1393_s27, 128  }
 0x7c4   : > { %1833 = vsyncadd (%p1662_p7), %s1393_s27, 4294967168  ;;  %s22_s16 = sadd.s32 1, %s1864_s16   ;;  %s2218_s23 = sld [smem:[#allocation6_spill]] }
 0x7c5   : > { %p19_p10 = scmp.ge.s32.totalorder %s22_s16, 6   ;;  %s2219_s21 = sld [smem:[#allocation7_spill]] }
 0x7c6   : > { %s2220_s30 = smov %s1840_s10  ;;  %s2221_s10 = smov %s1844_s11 }
 0x7c7   : > { %s2222_s11 = smov %s1996_s28  ;;  %s2223_s12 = smov %s1856_s14 }
 0x7c8   : > { %s2224_s13 = smov %s1860_s15  ;;  %21 = sbr.rel (!%p19_p10) target bundleno = 5 (0x5), region = 146 }
 0x7ca   : > { %s2225_s14 = smov %s2218_s23 }
 0x7cb   : > { %s2226_s15 = smov %s2219_s21 }
 0x7cd   :  { %1398 = vsyncpa [#allocation4], 1 }
 0x7ce   :  { %1400 = vsyncpa [#allocation4 + $0x1], 1 }

</bundles_post_ra>
